<compile_context>
chip_gen: v5e
topology: v5e:2x2
jax: 0.10.0
libtpu: 0.0.40
codegen_flags: <defaults>
</compile_context>

<pallas_src>
import jax
import jax.numpy as jnp
from jax.experimental import pallas as pl
from jax.experimental.pallas import tpu as pltpu

_MAX_CHUNKS = 8                 # number of parallel DMA chunks to issue
_TARGET_CHUNK_BYTES = 1 << 20   # ~1 MiB per chunk before we start splitting


def _chunk_bounds(rows: int, row_bytes: int):
    """Static (lo, hi) row ranges for chunked HBM->HBM DMAs."""
    total_bytes = rows * max(row_bytes, 1)
    by_size = -(-total_bytes // _TARGET_CHUNK_BYTES)  # ceil-div
    n = max(1, min(_MAX_CHUNKS, rows, by_size))
    base = rows // n
    rem = rows % n
    bounds = []
    lo = 0
    for k in range(n):
        hi = lo + base + (1 if k < rem else 0)
        bounds.append((lo, hi))
        lo = hi
    return tuple(bounds)


def _make_dma_identity_kernel(bounds):
    """Kernel that copies HBM->HBM via chunked async DMAs (no vreg traffic)."""

    def kernel(x_hbm, o_hbm, sem):
        copies = []
        for k, (lo, hi) in enumerate(bounds):
            cp = pltpu.make_async_copy(x_hbm.at[lo:hi], o_hbm.at[lo:hi], sem.at[k])
            cp.start()
            copies.append(cp)
        for cp in copies:
            cp.wait()

    return kernel


@jax.jit
def _pallas_identity(feature: jax.Array) -> jax.Array:
    """Direct HBM->HBM identity copy of a (batch, in_dim) array."""
    rows, in_dim = feature.shape
    row_bytes = in_dim * feature.dtype.itemsize
    bounds = _chunk_bounds(rows, row_bytes)

    return pl.pallas_call(
        _make_dma_identity_kernel(bounds),
        out_shape=jax.ShapeDtypeStruct(feature.shape, feature.dtype),
        in_specs=[pl.BlockSpec(memory_space=pl.ANY)],
        out_specs=pl.BlockSpec(memory_space=pl.ANY),
        scratch_shapes=[pltpu.SemaphoreType.DMA((len(bounds),))],
    )(feature)


class ArrayFeatureColumn:
    """JAX/Pallas port of quickmlp's ArrayFeatureColumn.

    fea_type must be 'array'; out_dim == in_dim; forward() is identity on a
    (batch, in_dim) float tensor. No learnable parameters.
    """

    def __init__(self, fea_name: str, fea_type: str, fea_space_size: int = -1,
                 in_dim: int = 1, out_dim: int = 1, padding_idx: int = -1):
        assert fea_type == "array", "ArrayFeatureColumn requires fea_type == 'array'"
        assert in_dim == out_dim
        self.name = fea_name
        self.type = fea_type
        self.space_size = None
        self.in_dim = in_dim
        self.out_dim = in_dim  # array features: out_dim == in_dim

    def _forward_check(self, feature: jax.Array) -> None:
        assert feature.ndim == 2
        assert feature.shape[1] == self.in_dim

    def __call__(self, feature: jax.Array, *, materialize: bool = False) -> jax.Array:
        return self.forward(feature, materialize=materialize)

    def forward(self, feature: jax.Array, *, materialize: bool = False) -> jax.Array:
        self._forward_check(feature)
        if not materialize:
            # Pure pass-through: returning the input moves zero bytes and is
            # strictly faster than any kernel on every TPU generation.
            return feature
        # Optional Pallas path: chunked HBM->HBM DMA identity copy.
        return _pallas_identity(feature)

    @classmethod
    def new(cls, conf):
        return cls(fea_name=conf["name"], fea_type="array", fea_space_size=-1,
                   in_dim=conf["in_dim"], out_dim=conf["in_dim"], padding_idx=-1)


if __name__ == "__main__":
    key = jax.random.PRNGKey(0)
    batch, in_dim = 8, 32
    feature = jax.random.normal(key, (batch, in_dim), dtype=jnp.float32)

    col = ArrayFeatureColumn.new({"name": "my_array_feature", "in_dim": in_dim})

    # Default path: zero-cost identity (no kernel launched).
    out_fast = col(feature)
    assert out_fast is feature

    # Pallas path: chunked HBM->HBM DMA identity copy — run the kernel once.
    out_kernel = col.forward(feature, materialize=True)
    out_kernel = jax.block_until_ready(out_kernel)

    assert out_kernel.shape == feature.shape
    assert out_kernel.dtype == feature.dtype
    assert bool(jnp.all(out_kernel == feature))

    print("KERNEL_OK")
</pallas_src>

<mosaic_0001>
module attributes {stable_mosaic.version = 11 : i64} {
  func.func @kernel(%arg0: memref<8x32xf32, #tpu.memory_space<any>>, %arg1: memref<8x32xf32, #tpu.memory_space<any>>, %arg2: memref<1x!tpu.dma_semaphore, #tpu.memory_space<semaphore_mem>>) attributes {dimension_semantics = [], scalar_prefetch = 0 : i64, scratch_operands = 1 : i64, tpu.core_type = #tpu.core_type<tc>} {
    %c0_i32 = arith.constant 0 : i32
    %c0_i32_0 = arith.constant 0 : i32
    %c0_i32_1 = arith.constant 0 : i32
    %0 = tpu.memref_slice %arg0[%c0_i32_0, %c0_i32_1] : memref<8x32xf32, #tpu.memory_space<any>> -> memref<8x32xf32, #tpu.memory_space<any>>
    %c0_i32_2 = arith.constant 0 : i32
    %c0_i32_3 = arith.constant 0 : i32
    %1 = tpu.memref_slice %arg1[%c0_i32_2, %c0_i32_3] : memref<8x32xf32, #tpu.memory_space<any>> -> memref<8x32xf32, #tpu.memory_space<any>>
    %2 = tpu.memref_slice %arg2[%c0_i32] : memref<1x!tpu.dma_semaphore, #tpu.memory_space<semaphore_mem>> -> memref<1x!tpu.dma_semaphore, #tpu.memory_space<semaphore_mem>>
    %3 = tpu.memref_squeeze %2 : memref<1x!tpu.dma_semaphore, #tpu.memory_space<semaphore_mem>> -> memref<!tpu.dma_semaphore, #tpu.memory_space<semaphore_mem>>
    tpu.enqueue_dma source(%0 : memref<8x32xf32, #tpu.memory_space<any>>) target(%1 : memref<8x32xf32, #tpu.memory_space<any>>) target_semaphore(%3 : memref<!tpu.dma_semaphore, #tpu.memory_space<semaphore_mem>>)
    %c0_i32_4 = arith.constant 0 : i32
    %c0_i32_5 = arith.constant 0 : i32
    %c0_i32_6 = arith.constant 0 : i32
    %4 = tpu.memref_slice %arg0[%c0_i32_5, %c0_i32_6] : memref<8x32xf32, #tpu.memory_space<any>> -> memref<8x32xf32, #tpu.memory_space<any>>
    %c0_i32_7 = arith.constant 0 : i32
    %c0_i32_8 = arith.constant 0 : i32
    %5 = tpu.memref_slice %arg1[%c0_i32_7, %c0_i32_8] : memref<8x32xf32, #tpu.memory_space<any>> -> memref<8x32xf32, #tpu.memory_space<any>>
    %6 = tpu.memref_slice %arg2[%c0_i32_4] : memref<1x!tpu.dma_semaphore, #tpu.memory_space<semaphore_mem>> -> memref<1x!tpu.dma_semaphore, #tpu.memory_space<semaphore_mem>>
    %7 = tpu.memref_squeeze %6 : memref<1x!tpu.dma_semaphore, #tpu.memory_space<semaphore_mem>> -> memref<!tpu.dma_semaphore, #tpu.memory_space<semaphore_mem>>
    tpu.wait_dma2 semaphore(%7 : memref<!tpu.dma_semaphore, #tpu.memory_space<semaphore_mem>>) src(%4 : memref<8x32xf32, #tpu.memory_space<any>>) dst(%5 : memref<8x32xf32, #tpu.memory_space<any>>)
    return
  }
}

</mosaic_0001>

<bundles_post_ra>
// kernel: _pallas_identity.1
= control target key start
LH: loop header
LB: loop body
LE: loop exit
PB: predicated region body
PF: predicated region fallthrough
CT: control target
= control target key end

     0   :  { %s32_s12 = smov [#allocation2]   ;;  %s33_s13 = smov [#allocation3]   ;;  %s51_s0 = inlined_call_operand.hbm [shape: f32[8,32], index: 0, kind: input, shape index: {}]   ;;  %s52_s1 = inlined_call_operand.hbm [shape: f32[8,32], index: 1, kind: output, shape index: {}]  }
   0x1   :  { %s10_s8 = sshll.u32 %s51_s0, 4  ;;  %s12_s11 = sshll.u32 %s52_s1, 4  ;;  %s11_s8 = int_to_ptr.hbm [resolvable:$true] %s10_s8  ;;  %s13_s11 = int_to_ptr.hbm [resolvable:$true] %s12_s11 }
   0x2   :  { %s34_s14 = smov 0  }
   0x3   :  { %16 = dma.general %s11_s8, 128, %s13_s11, %s32_s12, %s33_s13, [#allocation4], %s34_s14, 0  }
   0x4   :  { %30 = dma.done.wait [#allocation2], 128 }
   0x5   :  { %31 = vsyncadd [#allocation2], 4294967168 }
   0x6   :  { %20 = vsyncmov [#allocation2] }
   0x9   :  { %s21_s15 = vpop.sfrf %20 }
   0xa   :  { %p26_p0 = scmp.ne.s32.totalorder %s21_s15, 0 }
   0xc   :  { %25 = shalt.err (%p26_p0)  }

</bundles_post_ra>
